<compile_context>
chip_gen: v5e
topology: v5e:2x2
jax: 0.10.0
libtpu: 0.0.40
codegen_flags: <defaults>
</compile_context>

<pallas_src>
import jax
import jax.numpy as jnp
from jax.experimental import pallas as pl
from jax.experimental.pallas import tpu as pltpu

_EPS = 1e-10


def _l2norm_kernel(x_ref, w_ref, o_ref):
    # x_ref / o_ref: (TILE_N, C, TILE_HW)    w_ref: (1, C, 1), grid-resident.
    # All math in f32 (v5e has no bf16 VPU/EUP; on v6e/v7x the single rounding
    # at the end matches the f32 reference more closely anyway).
    x = x_ref[...].astype(jnp.float32)
    w = w_ref[...].astype(jnp.float32)
    # Sum of squares over channels: per-plane sublane reduction (XLU), lane-dense.
    sumsq = jnp.sum(x * x, axis=1, keepdims=True)          # (TN, 1, THW)
    # eps is added OUTSIDE the sqrt to match the PyTorch module exactly.
    norm = jnp.sqrt(sumsq) + jnp.float32(_EPS)
    # NOTE: on ragged (masked) edge blocks the padded lanes/rows feed garbage
    # into sqrt/reciprocal; results are lane-local and never stored, so safe.
    inv = pl.reciprocal(norm, approx=False)                 # exact, parity w/ torch.div
    o_ref[...] = (x * (inv * w)).astype(o_ref.dtype)


def _choose_tiling(n, c, hw, itemsize, *,
                   block_budget_bytes=4 * 1024 * 1024, min_grid_points=8):
    """Pick (tile_n, tile_hw) for a (N, C, HW) layout.

    Byte math uses the *padded* channel count (sublane multiple per dtype) and
    halves the budget for sub-32-bit inputs (in-kernel f32 upcast + x*x temps).
    Always tries to give the grid >= min_grid_points steps so the pipeline
    overlaps DMA with compute and v7x megacore has >= 2 parallel points.
    """
    sublane = {4: 8, 2: 16, 1: 32}.get(itemsize, 8)
    c_pad = pl.cdiv(c, sublane) * sublane
    hw_pad = pl.cdiv(hw, 128) * 128
    budget = block_budget_bytes
    if itemsize < 4:
        budget //= 2                               # f32 upcast temporaries

    plane_bytes = c_pad * hw_pad * itemsize        # one (1, C, HW) block

    # --- Batch-blocked mode: several small images per block (large-N, small-HW).
    if 2 * plane_bytes <= budget:
        tile_n = min(budget // plane_bytes, max(1, n // min_grid_points))
        # Prefer an exact divide of N so no ragged (masked) tail block is needed.
        while tile_n > 1 and n % tile_n:
            tile_n -= 1
        if tile_n >= 2:
            return int(tile_n), hw

    # --- Spatial-split mode: one image per block, tile HW on the lane axis.
    # Largest 128-multiple lane tile inside the byte budget ...
    lanes_budget = max(128, (budget // (c_pad * itemsize)) // 128 * 128)
    # ... but split enough that the whole grid has ~min_grid_points steps.
    hw_tiles_wanted = pl.cdiv(min_grid_points, max(n, 1))
    if hw_tiles_wanted > 1:
        lanes_grid = pl.cdiv(pl.cdiv(hw, hw_tiles_wanted), 128) * 128
    else:
        lanes_grid = hw_pad
    tile_hw = min(lanes_budget, lanes_grid)
    if tile_hw >= hw:
        tile_hw = hw                               # full spatial extent
    return 1, int(tile_hw)


def l2norm_pallas(x_nchw, weight, *, tile_n=None, tile_hw=None):
    """x_nchw: (N, C, H, W); weight: (C,). Returns (N, C, H, W)."""
    n, c, h, w = x_nchw.shape
    hw = h * w

    # Pure reshapes (no transpose): channels -> sublanes, spatial -> lanes.
    x3d = x_nchw.reshape(n, c, hw)
    w3d = weight.reshape(1, c, 1)

    auto_tn, auto_thw = _choose_tiling(n, c, hw, jnp.dtype(x_nchw.dtype).itemsize)
    if tile_n is None:
        tile_n = auto_tn
    if tile_hw is None:
        tile_hw = auto_thw
    assert tile_hw == hw or tile_hw % 128 == 0, \
        "tile_hw must be the full HW extent or a multiple of 128"

    grid = (pl.cdiv(n, tile_n), pl.cdiv(hw, tile_hw))   # ragged tails are masked

    out3d = pl.pallas_call(
        _l2norm_kernel,
        out_shape=jax.ShapeDtypeStruct((n, c, hw), x_nchw.dtype),
        grid_spec=pltpu.PrefetchScalarGridSpec(
            num_scalar_prefetch=0,
            grid=grid,
            in_specs=[
                pl.BlockSpec((tile_n, c, tile_hw), lambda b, s: (b, 0, s)),
                # tiny weight block, constant index -> stays resident in VMEM
                pl.BlockSpec((1, c, 1), lambda b, s: (0, 0, 0)),
            ],
            out_specs=pl.BlockSpec((tile_n, c, tile_hw), lambda b, s: (b, 0, s)),
        ),
        compiler_params=pltpu.CompilerParams(
            # No cross-block reduction: both axes independent -> megacore sharding.
            dimension_semantics=("parallel", "parallel"),
            # 4 MiB blocks * (2 in + 2 out) buffers + weight << 32 MiB; safe on
            # v7x (64 MiB physical) while raising v5e's 16 MiB scoped default.
            vmem_limit_bytes=32 * 1024 * 1024,
        ),
    )(x3d, w3d)

    return out3d.reshape(n, c, h, w)


def l2norm_reference(x_nchw, weight, eps=_EPS):
    x = x_nchw.astype(jnp.float32)
    wf = weight.astype(jnp.float32)
    norm = jnp.sqrt(jnp.sum(x * x, axis=1, keepdims=True)) + eps
    return ((x / norm) * wf[None, :, None, None]).astype(x_nchw.dtype)


if __name__ == "__main__":
    key = jax.random.PRNGKey(0)
    k1, k2, k3, k4, k5 = jax.random.split(key, 5)

    def check(x, weight, atol, rtol, **kw):
        out = jax.block_until_ready(l2norm_pallas(x, weight, **kw))
        ref = l2norm_reference(x, weight)
        assert out.shape == x.shape and out.dtype == x.dtype
        assert jnp.allclose(out.astype(jnp.float32), ref.astype(jnp.float32),
                            atol=atol, rtol=rtol), "mismatch vs reference"

    # 1) Module config from the spec: L2Norm(n_channels=4, scale=20)
    c = 4
    w4 = jnp.full((c,), 20.0, dtype=jnp.float32)
    x1 = jax.random.normal(k1, (2, c, 16, 16), dtype=jnp.float32)
    check(x1, w4, atol=1e-4, rtol=1e-4)                     # spatial mode, grid (2,2)

    # 2) SSD conv4_3-like shape: C=512, 38x38 -> HW split into ~6 lane tiles
    w512 = jnp.full((512,), 20.0, dtype=jnp.float32)
    x2 = jax.random.normal(k2, (1, 512, 38, 38), dtype=jnp.float32)
    check(x2, w512, atol=1e-4, rtol=1e-4)                   # spatial mode, grid (1,6)

    # 3) Large-N / small-HW: batch-blocked mode (4 images per block, 8 steps)
    x3 = jax.random.normal(k3, (32, c, 16, 16), dtype=jnp.float32)
    check(x3, w4, atol=1e-4, rtol=1e-4)                     # batch mode, grid (8,1)

    # 4) Ragged lane tail: HW=200 with forced 128-lane tiles (masked edge block)
    x4 = jax.random.normal(k4, (1, c, 10, 20), dtype=jnp.float32)
    check(x4, w4, atol=1e-4, rtol=1e-4, tile_hw=128)        # grid (1,2)

    # 5) bf16 input (sublane=16 padding + halved block budget path)
    x5 = jax.random.normal(k5, (2, c, 16, 16), dtype=jnp.bfloat16)
    check(x5, w4, atol=2e-2, rtol=2e-2)

    print("KERNEL_OK")
</pallas_src>

<mosaic_0001>
module attributes {stable_mosaic.version = 11 : i64} {
  func.func @_l2norm_kernel(%arg0: i32, %arg1: i32, %arg2: memref<1x4x128xf32, #tpu.memory_space<vmem>>, %arg3: memref<1x4x1xf32, #tpu.memory_space<vmem>>, %arg4: memref<1x4x128xf32, #tpu.memory_space<vmem>>) attributes {dimension_semantics = [#tpu.dimension_semantics<parallel>, #tpu.dimension_semantics<parallel>], iteration_bounds = array<i64: 2, 2>, scalar_prefetch = 0 : i64, scratch_operands = 0 : i64, tpu.core_type = #tpu.core_type<tc>, window_params = [{transform_indices = @transform_0, window_bounds = array<i64: 1, 4, 128>}, {pipeline_mode = #tpu.pipeline_mode<synchronous>, transform_indices = @transform_1, window_bounds = array<i64: 1, 4, 1>}, {transform_indices = @transform_2, window_bounds = array<i64: 1, 4, 128>}]} {
    %c0 = arith.constant 0 : index
    %c0_0 = arith.constant 0 : index
    %c0_1 = arith.constant 0 : index
    %0 = vector.load %arg2[%c0, %c0_0, %c0_1] : memref<1x4x128xf32, #tpu.memory_space<vmem>>, vector<1x4x128xf32>
    %c0_2 = arith.constant 0 : index
    %c0_3 = arith.constant 0 : index
    %c0_4 = arith.constant 0 : index
    %1 = vector.load %arg3[%c0_2, %c0_3, %c0_4] : memref<1x4x1xf32, #tpu.memory_space<vmem>>, vector<1x4x1xf32>
    %2 = arith.mulf %0, %0 : vector<1x4x128xf32>
    %cst = arith.constant dense<0.000000e+00> : vector<1x128xf32>
    %3 = vector.multi_reduction <add>, %2, %cst [1] : vector<1x4x128xf32> to vector<1x128xf32>
    %4 = vector.shape_cast %3 : vector<1x128xf32> to vector<1x1x128xf32>
    %5 = math.sqrt %4 : vector<1x1x128xf32>
    %cst_5 = arith.constant 1.000000e-10 : f32
    %6 = vector.broadcast %cst_5 : f32 to vector<1x1x128xf32>
    %7 = arith.addf %5, %6 : vector<1x1x128xf32>
    %8 = tpu.reciprocal %7 : vector<1x1x128xf32> -> vector<1x1x128xf32>
    %9 = vector.broadcast %8 : vector<1x1x128xf32> to vector<1x4x128xf32>
    %10 = vector.broadcast %1 : vector<1x4x1xf32> to vector<1x4x128xf32>
    %11 = arith.mulf %9, %10 : vector<1x4x128xf32>
    %12 = arith.mulf %0, %11 : vector<1x4x128xf32>
    %c0_6 = arith.constant 0 : index
    %c0_7 = arith.constant 0 : index
    %c0_8 = arith.constant 0 : index
    %13 = vector.load %arg4[%c0_6, %c0_7, %c0_8] : memref<1x4x128xf32, #tpu.memory_space<vmem>>, vector<1x4x128xf32>
    tpu.vector_store %arg4[%c0_6, %c0_7, %c0_8], %12 {strides = array<i32>} : memref<1x4x128xf32, #tpu.memory_space<vmem>>, vector<1x4x128xf32>,
    return
  }
  func.func @transform_0(%arg0: i32, %arg1: i32) -> (i32, i32, i32) {
    %c0_i32 = arith.constant 0 : i32
    %c0_i32_0 = arith.constant 0 : i32
    return %arg0, %c0_i32, %arg1 : i32, i32, i32
  }
  func.func @transform_1(%arg0: i32, %arg1: i32) -> (i32, i32, i32) {
    %c0_i32 = arith.constant 0 : i32
    %c0_i32_0 = arith.constant 0 : i32
    %c0_i32_1 = arith.constant 0 : i32
    %c0_i32_2 = arith.constant 0 : i32
    return %c0_i32, %c0_i32_0, %c0_i32_1 : i32, i32, i32
  }
  func.func @transform_2(%arg0: i32, %arg1: i32) -> (i32, i32, i32) {
    %c0_i32 = arith.constant 0 : i32
    %c0_i32_0 = arith.constant 0 : i32
    return %arg0, %c0_i32, %arg1 : i32, i32, i32
  }
}

</mosaic_0001>

<bundles_post_ra>
// kernel: tpu_custom_call.1
= control target key start
LH: loop header
LB: loop body
LE: loop exit
PB: predicated region body
PF: predicated region fallthrough
CT: control target
= control target key end

     0   :  { %7 = vsyncpa [#allocation3], 0  ;;  %s722_s0 = inlined_call_operand.hbm [shape: f32[2,4,256], index: 0, kind: input, shape index: {}]   ;;  %s723_s1 = inlined_call_operand.vmem [shape: f32[1,4,1], index: 1, kind: input, shape index: {}]   ;;  %s724_s2 = inlined_call_operand.hbm [shape: f32[2,4,256], index: 2, kind: output, shape index: {}]  }
   0x1   :  { %9 = vsyncpa [#allocation3 + $0x1], 0 }
   0x2   :  { %10 = vsyncpa [#allocation4], 0 }
   0x3   :  { %12 = vsyncpa [#allocation4 + $0x1], 0  ;;  %s573_s9 = smov 0   ;;  %s575_s10 = smov 0  }
   0x4   :  { %s577_s11 = smov 0   ;;  %s579_s12 = smov 0  }
   0x5   :  { %s581_s13 = smov 0   ;;  %s583_s14 = smov 0  }
   0x6   :  { %s585_s15 = smov 0   ;;  %s587_s16 = smov 0  }
   0x7 LB: > { %s328_s17 = sadd.s32 4294967295, %s555_s16   ;;  %s329_s18 = sadd.s32 4294967294, %s555_s16   ;;  %s555_s16 = sphi %s587_s16, %s18_s16   ;;  %s551_s15 = sphi %s585_s15, %s735_s15   ;;  %s547_s14 = sphi %s583_s14, %s734_s14   ;;  %s543_s13 = sphi %s581_s13, %s733_s13   ;;  %s539_s12 = sphi %s579_s12, %s732_s12   ;;  %s535_s11 = sphi %s577_s11, %s731_s11   ;;  %s531_s10 = sphi %s575_s10, %s730_s10   ;;  %s527_s9 = sphi %s573_s9, %s729_s9  }
   0x8   : > { %s27_s19 = sadd.s32 1, %s547_s14  ;;  %s30_s20 = sadd.s32 1, %s551_s15 }
   0x9   : > { %p28_p0 = scmp.ge.s32.totalorder %s27_s19, 2  ;;  %s39_s21 = sadd.s32 1, %s535_s11 }
   0xa   : > { %p46_p1 = scmp.ne.s32.totalorder %s535_s11, %s531_s10  ;;  %p47_p2 = scmp.eq.s32.totalorder %s555_s16, 0 }
   0xb   : > { %s737_s19 = smov (%p28_p0, %s27_s19), 0  ;;  %s739_s20 = smov (!%p28_p0, %s30_s20), %s551_s15 }
   0xc   : > { %s35_s22 = ssub.s32 %s547_s14, %s737_s19  ;;  %p626_p3 = por %p47_p2, %p46_p1 }
   0xd   : > { %p32_p4 = scmp.ge.s32.totalorder %s739_s20, 2  ;;  %p52_p5 = scmp.ne.s32.totalorder %s531_s10, %s527_s9 }
   0xe   : > { %p53_p6 = scmp.eq.s32.totalorder %s328_s17, 0  ;;  %p99_p7 = scmp.eq.s32.totalorder %s328_s17, 3 }
   0xf   : > { %s741_s20 = smov (%p32_p4, %s739_s20), 0  ;;  %p105_p10 = scmp.eq.s32.totalorder %s329_s18, 3 }
  0x10   : > { %p634_p8 = por %p53_p6, %p52_p5  ;;  %p638_p9 = por %p99_p7, %p46_p1 }
  0x11   : > { %s34_s26 = ssub.s32 %s551_s15, %s741_s20  ;;  %p644_p12 = por %p105_p10, %p52_p5 }
  0x12   : > { %s36_s27 = sor.u32 %s35_s22, %s34_s26  ;;  %p355_p13 = scmp.lt.s32.totalorder %s555_s16, 4 }
  0x13   : > { %p37_p11 = scmp.eq.s32.totalorder %s36_s27, 0  ;;  %s128_s29 = sand.u32 1, %s535_s11  }
  0x14   : > { %s332_s3 = sshll.u32 %s128_s29, 2  ;;  %s333_s4 = sshll.u32 %s551_s15, 1 }
  0x15   : > { %s651_s30 = scalar_select %p37_p11, %s535_s11, %s39_s21  }
  0x16   : > { %s136_s5 = sadd.s32 %s547_s14, %s333_s4  ;;  %s132_s6 = scalar_lea.vmem [#allocation2], %s332_s3 }
  0x17   : > { %s142_s7 = sshll.u32 %s132_s6, 4  ;;  %s334_s8 = sshll.u32 %s136_s5, 2  ;;  %s143_s7 = int_to_ptr.vmem [resolvable:$true] %s142_s7 }
  0x18   : > { %s138_s22 = scalar_lea.hbm %s722_s0, %s334_s8  ;;  %p348_p0 = pnand %p355_p13, %p626_p3 }
  0x19   : > { %s140_s26 = sshll.u32 %s138_s22, 4  ;;  %p335_p1 = scmp.ge.s32.totalorder %s555_s16, 1  ;;  %s141_s26 = int_to_ptr.hbm [resolvable:$true] %s140_s26 }
  0x1a   : > { %s129_s27 = scalar_lea.sflag [#allocation3], %s128_s29  ;;  %p147_p2 = scmp.lt.s32.totalorder %s555_s16, 5 }
  0x1b   : > { %350 = dma.hbm_to_vmem [thread:$0]  (!%p348_p0), %s141_s26, 64, %s143_s7, %s129_s27  }
  0x1c   : > { %p148_p4 = pnand %p335_p1, %p147_p2 }
  0x1d   : > { %s663_s21 = sand.u32 (!%p148_p4), 1, %s531_s10  }
  0x1e   : > { %151 = sbr.rel (%p148_p4) target bundleno = 160 (0xa0), region = 28  ;;  %s336_s3 = sshll.u32 (!%p148_p4), %s663_s21, 2 }
  0x1f   : > { %s154_s4 = scalar_lea.sflag (!%p148_p4), [#allocation3], %s663_s21  ;;  %s157_s23 = scalar_lea.vmem (!%p148_p4), [#allocation2], %s336_s3 }
  0x23   : > { %518 = dma.done.wait (%p634_p8), %s154_s4, 64  }
  0x24   : > { %520 = vsyncadd (%p634_p8), %s154_s4, 4294967232  ;;  %v557_v0 = vmov 0   ;;  %v180_v1 = vld [vmem:[%s723_s1] sm:$0xf]  ;;  %vm182_vm0 = vcmask 1043456   ;;  %s339_s24 = sshll.u32 %s543_s13, 1 }
  0x25   : > { %422 = vset.pattern.permute.xlu0 %v557_v0  ;;  %v179_v2 = vld [vmem:[%s157_s23] sm:$0xf]  ;;  %s236_s6 = sadd.s32 %s539_s12, %s339_s24  ;;  %s178_s13 = scalar_lea.vmem [#allocation5], %s336_s3 }
  0x26   : > { %219 = vperm.xlu0 %422, %v180_v1   ;;  %v181_v3 = vmul.f32 %v179_v2, %v179_v2  ;;  %s340_s7 = sshll.u32 %s236_s6, 2  ;;  %s240_s22 = sshll.u32 %s178_s13, 4  ;;  %s241_s22 = int_to_ptr.vmem [resolvable:$true] %s240_s22 }
  0x27   : > { %s238_s18 = scalar_lea.hbm %s724_s2, %s340_s7  ;;  %s226_s12 = scalar_lea.sflag [#allocation4], %s663_s21 }
  0x28   : > { %v183_v4 = vsel %vm182_vm0, %v181_v3, 0.0  ;;  %s242_s26 = sshll.u32 %s238_s18, 4  ;;  %s477_s5 = scalar_lea.hbm %s724_s2, 16  ;;  %s243_s26 = int_to_ptr.hbm [resolvable:$true] %s242_s26 }
  0x29   : > { %v184_v5 = vrot.slane %v183_v4, 4  ;;  %s471_s27 = sshra.s32 %s243_s26, 4  ;;  %s472_s27 = int_to_ptr.hbm [resolvable:$true] %s471_s27 }
  0x2a   : > { %s473_s4 = scalar_lea.hbm %s472_s27, 4  ;;  %p478_p7 = scmp.lt.s32.totalorder %s472_s27, %s724_s2 }
  0x2b   : > { %v185_v6 = vadd.f32 %v184_v5, %v183_v4  ;;  %p474_p3 = scmp.ne.s32.totalorder %s472_s27, %s473_s4  ;;  %p479_p8 = scmp.lt.s32.totalorder %s477_s5, %s473_s4 }
  0x2d   : > { %v186_v7 = vrot.slane %v185_v6, 2  ;;  %p475_p5 = pnand %p474_p3, %p638_p9  ;;  %p480_p10 = por %p479_p8, %p478_p7 }
  0x2f   : > { %v187_v8 = vadd.f32 %v186_v7, %v185_v6  ;;  %p476_p6 = pneg %p475_p5 }
  0x31   : > { %v188_v9 = vrot.slane %v187_v8, 1  ;;  %p481_p11 = pnand %p480_p10, %p476_p6 }
  0x33   : > { %v189_v10 = vadd.f32 %v188_v9, %v187_v8 }
  0x35   : > { %423 = vrsqrt.f32 %v189_v10  ;;  %vm197_vm1 = vcmp.eq.f32.partialorder %v189_v10, inf  ;;  %v200_v18 = vand.u32 2147483648, %v189_v10  ;;  %vm199_vm2 = vcmp.eq.f32.partialorder %v189_v10, 0.0 }
  0x3b   : > { %v424_v11 = vpop.eup %423 }
  0x3c   : > { %v191_v12 = vmul.f32 %v424_v11, %v189_v10 }
  0x3e   : > { %v192_v13 = vmul.f32 %v424_v11, %v191_v12 }
  0x40   : > { %v193_v14 = vmul.f32 0.5, %v192_v13 }
  0x42   : > { %v194_v15 = vsub.f32 1.5, %v193_v14 }
  0x44   : > { %v195_v16 = vmul.f32 %v424_v11, %v194_v15 }
  0x46   : > { %v196_v17 = vmul.f32 %v195_v16, %v189_v10 }
  0x48   : > { %v198_v19 = vsel %vm197_vm1, %v189_v10, %v196_v17 }
  0x49   : > { %v201_v20 = vsel %vm199_vm2, %v200_v18, %v198_v19 }
  0x4a   : > { %v202_v21 = vadd.f32 1e-10, %v201_v20 }
  0x4c   : > { %425 = vrcp.f32 %v202_v21  ;;  %vm208_vm3 = vweird.f32 %v202_v21  ;;  %v214_v26 = vand.u32 2147483648, %v202_v21  ;;  %v212_v28 = vand.u32 2147483647, %v202_v21 }
  0x4e   : > { %v215_v29 = vor.u32 1.1754944e-38, %v214_v26  ;;  %vm213_vm6 = vcmp.eq.f32.partialorder %v212_v28, 8.507059e+37 }
  0x52   : > { %v426_v22 = vpop.eup %425 }
  0x53   : > { %v204_v23 = vmul.f32 %v426_v22, %v202_v21  ;;  %vm209_vm4 = vweird.f32 %v426_v22 }
  0x54   : > { %vm210_vm5 = vmor %vm208_vm3, %vm209_vm4 }
  0x55   : > { %v205_v24 = vsub.f32 1.0, %v204_v23 }
  0x57   : > { %v206_v25 = vmul.f32 %v426_v22, %v205_v24 }
  0x59   : > { %v207_v27 = vadd.f32 %v426_v22, %v206_v25 }
  0x5b   : > { %v211_v30 = vsel %vm210_vm5, %v426_v22, %v207_v27 }
  0x5c   : > { %v216_v31 = vsel %vm213_vm6, %v215_v29, %v211_v30 }
  0x98   : > { %v220_v32 = vpop.permute.xlu0 %219 }
  0x99   : > { %v222_v33 = vmul.f32 %v220_v32, %v216_v31 }
  0x9b   : > { %v223_v34 = vmul.f32 %v222_v33, %v179_v2 }
  0x9d   : > { %224 = vst [vmem:[%s178_s13] sm:$0xf] %v223_v34 }
  0x9e   : > { %484 = shalt.err (!%p481_p11)
}
  0x9f   : > { %345 = dma.vmem_to_hbm [thread:$0]  (%p638_p9), %s241_s22, 64, %s243_s26, %s226_s12  }
  0xa0 PF: > { %p356_p13 = scmp.ge.s32.totalorder %s555_s16, 2  ;;  %s254_s21 = sand.u32 1, %s527_s9  }
  0xa1   : > { %s255_s6 = scalar_lea.sflag [#allocation4], %s254_s21 }
  0xa2   : > { %p352_p0 = pnand %p356_p13, %p644_p12 }
  0xa4   : > { %p353_p1 = pneg %p352_p0 }
  0xa6   : > { %522 = dma.done.wait (%p353_p1), %s255_s6, 64  }
  0xa7   : > { %524 = vsyncadd (%p353_p1), %s255_s6, 4294967232  ;;  %s18_s16 = sadd.s32 1, %s555_s16   ;;  %s729_s9 = smov %s531_s10 }
  0xa8   : > { %p15_p2 = scmp.ge.s32.totalorder %s18_s16, 6   ;;  %s730_s10 = smov %s535_s11 }
  0xa9   : > { %s731_s11 = smov %s651_s30  ;;  %s732_s12 = smov %s547_s14 }
  0xaa   : > { %s733_s13 = smov %s551_s15  ;;  %s734_s14 = smov %s737_s19 }
  0xab   : > { %s735_s15 = smov %s741_s20  ;;  %17 = sbr.rel (!%p15_p2) target bundleno = 7 (0x7), region = 73 }
  0xb0   :  { %261 = vsyncpa [#allocation3], 1 }
  0xb1   :  { %263 = vsyncpa [#allocation3 + $0x1], 1 }
  0xb2   :  { %264 = vsyncpa [#allocation4], 1 }
  0xb3   :  { %266 = vsyncpa [#allocation4 + $0x1], 1 }

</bundles_post_ra>
